<compile_context>
chip_gen: v6e
topology: v6e:2x2x1
jax: 0.10.0
libtpu: 0.0.40
codegen_flags: <defaults>
</compile_context>

<pallas_src>
import functools

import jax
import jax.numpy as jnp
from jax import lax
from jax.experimental import pallas as pl
from jax.experimental.pallas import tpu as pltpu

BN_EPS = 1e-5


# ---------------------------- fused Pallas kernel ----------------------------

def _fused_ir_kernel(*refs, stride, H, W, has_expand, use_shortcut, has_sel):
    """One grid step = one image, layout (C, H*W): C in sublanes, spatial in lanes.

    refs (in order):
      x_ref   : (1, Cin, H*W)
      we_ref  : (hid, Cin)   only if has_expand   (BN1 scale folded in)
      b1_ref  : (hid, 1)     only if has_expand
      wd_ref  : (hid, 9)     3x3 depthwise weights (BN2 scale folded in)
      b2_ref  : (hid, 1)
      wp_ref  : (Cout, hid)  (BN3 scale folded in)
      b3_ref  : (Cout, 1)
      sel_ref : (n_int*W, Ho*Wo)  only if has_sel (stride != 1)
      o_ref   : (1, Cout, Ho*Wo)
    """
    refs = list(refs)
    x_ref = refs.pop(0)
    we_ref = refs.pop(0) if has_expand else None
    b1_ref = refs.pop(0) if has_expand else None
    wd_ref = refs.pop(0)
    b2_ref = refs.pop(0)
    wp_ref = refs.pop(0)
    b3_ref = refs.pop(0)
    sel_ref = refs.pop(0) if has_sel else None
    o_ref = refs.pop(0)

    s = stride
    Ho = (H - 1) // s + 1
    hid = wd_ref.shape[0]
    n_int = s * (Ho - 1) + 1          # conv-centre rows needed (all in-image)
    THi = n_int + 2                   # + bottom-halo row + zero "row -1" row
    L = THi * W
    n_dense = n_int * W               # dense (stride-1) conv output positions

    def expand(v):                    # v: (Cin, M) -> (hid, M)
        if has_expand:
            e = jnp.dot(we_ref[...], v, preferred_element_type=jnp.float32)
            return jnp.clip(e + b1_ref[...], 0.0, 6.0)
        return v.astype(jnp.float32)  # expand_ratio == 1: no 1x1 expand

    # ---- stage 1: 1x1 expand (+BN, ReLU6); build the flat slab --------------
    # slab rows: [image rows 0..n_int-1 | bottom-halo row | zero row]; reads of
    # "row -1" wrap (mod L) onto the zero tail, realizing the conv zero-pad.
    e_int = expand(x_ref[0, :, :n_int * W])
    if n_int <= H - 1:                # bottom halo row exists inside the image
        e_bot = expand(x_ref[0, :, n_int * W:(n_int + 1) * W])
    else:                             # bottom halo is below the image -> pad 0
        e_bot = jnp.zeros((hid, W), jnp.float32)
    e_top = jnp.zeros((hid, W), jnp.float32)   # image row -1 (zero padding)
    slab = jnp.concatenate([e_int, e_bot, e_top], axis=1)      # (hid, L)

    def window(base):
        # slab[:, (q + base) mod L] for q in [0, n_dense); static base -> the
        # compiler lowers these to cheap lane rotates (XLU).
        if base >= 0:
            return slab[:, base:base + n_dense]
        return jnp.concatenate(
            [slab[:, L + base:], slab[:, :n_dense + base]], axis=1)

    # ---- stage 2: 3x3 depthwise (+BN, ReLU6), dense over the n_int rows -----
    wd = wd_ref[...]                                            # (hid, 9)
    col = lax.broadcasted_iota(jnp.int32, (1, n_dense), 1) % W
    acc = jnp.zeros((hid, n_dense), jnp.float32)
    for dw in (-1, 0, 1):
        part = jnp.zeros((hid, n_dense), jnp.float32)
        for dh in (-1, 0, 1):
            k = (dh + 1) * 3 + (dw + 1)
            part = part + window(dh * W + dw) * wd[:, k:k + 1]
        if dw == -1:                  # output col 0 has no left neighbour
            part = jnp.where(col > 0, part, 0.0)
        elif dw == 1:                 # output col W-1 has no right neighbour
            part = jnp.where(col < W - 1, part, 0.0)
        acc = acc + part
    y = jnp.clip(acc + b2_ref[...], 0.0, 6.0)                   # (hid, n_dense)

    # ---- stride-2: subsample dense rows/cols with a 0/1 selection matmul ----
    if has_sel:
        y = jnp.dot(y, sel_ref[...], preferred_element_type=jnp.float32)

    # ---- stage 3: 1x1 project (+BN) + optional residual ---------------------
    p = jnp.dot(wp_ref[...], y, preferred_element_type=jnp.float32) + b3_ref[...]
    if use_shortcut:                  # stride == 1 and Cin == Cout
        p = p + x_ref[0]
    o_ref[0] = p.astype(o_ref.dtype)


# --------------------------------- wrapper -----------------------------------

def _bn_fold(gamma, beta, mean, var):
    scale = gamma / jnp.sqrt(var + BN_EPS)
    shift = beta - mean * scale
    return scale, shift


def _vmem_limit_bytes():
    try:
        cap = int(pltpu.get_tpu_info().vmem_capacity_bytes)
    except Exception:                 # query unsupported -> assume v7x (64 MiB)
        cap = 64 * 1024 * 1024
    return int(max(32 * 1024 * 1024, min(cap * 3 // 4, 96 * 1024 * 1024)))


def inverted_residual(x_nchw, params, *, stride, expand_ratio):
    x = x_nchw.astype(jnp.float32)
    N, Cin, H, W = x.shape
    assert H >= 2 and W >= 2, "spatial dims must be >= 2"
    has_expand = expand_ratio != 1
    hid = Cin * expand_ratio
    Cout = params["w_proj"].shape[0]
    use_shortcut = (stride == 1) and (Cin == Cout)
    Ho = (H - 1) // stride + 1
    Wo = (W - 1) // stride + 1

    operands = []
    in_specs = []

    # NCHW -> (N, C, H*W) is a free reshape (channels stay leading/sublane,
    # flattened spatial is the lane axis): no HBM transpose pass.
    x_flat = x.reshape(N, Cin, H * W)
    operands.append(x_flat)
    in_specs.append(pl.BlockSpec((1, Cin, H * W), lambda n: (n, 0, 0)))

    # ---- fold eval-mode BN scales into the conv weights ----
    if has_expand:
        s1, t1 = _bn_fold(*params["bn1"])
        we = (params["w_expand"] * s1[:, None]).astype(jnp.float32)   # (hid, Cin)
        b1 = t1[:, None].astype(jnp.float32)                          # (hid, 1)
        operands += [we, b1]
        in_specs += [pl.BlockSpec((hid, Cin), lambda n: (0, 0)),
                     pl.BlockSpec((hid, 1), lambda n: (0, 0))]

    s2, t2 = _bn_fold(*params["bn2"])
    wd = (params["w_dw"] * s2[:, None, None]).reshape(hid, 9).astype(jnp.float32)
    b2 = t2[:, None].astype(jnp.float32)
    s3, t3 = _bn_fold(*params["bn3"])
    wp = (params["w_proj"] * s3[:, None]).astype(jnp.float32)         # (Cout, hid)
    b3 = t3[:, None].astype(jnp.float32)
    operands += [wd, b2, wp, b3]
    in_specs += [pl.BlockSpec((hid, 9), lambda n: (0, 0)),
                 pl.BlockSpec((hid, 1), lambda n: (0, 0)),
                 pl.BlockSpec((Cout, hid), lambda n: (0, 0)),
                 pl.BlockSpec((Cout, 1), lambda n: (0, 0))]

    has_sel = stride != 1
    if has_sel:
        n_int = stride * (Ho - 1) + 1
        src = ((jnp.arange(Ho) * stride)[:, None] * W
               + (jnp.arange(Wo) * stride)[None, :])                  # (Ho, Wo)
        sel = (jnp.arange(n_int * W)[:, None]
               == src.reshape(1, -1)).astype(jnp.float32)             # (n_int*W, Ho*Wo)
        operands.append(sel)
        in_specs.append(pl.BlockSpec((n_int * W, Ho * Wo), lambda n: (0, 0)))

    kernel = functools.partial(
        _fused_ir_kernel, stride=stride, H=H, W=W,
        has_expand=has_expand, use_shortcut=use_shortcut, has_sel=has_sel)

    out_flat = pl.pallas_call(
        kernel,
        out_shape=jax.ShapeDtypeStruct((N, Cout, Ho * Wo), jnp.float32),
        grid=(N,),
        in_specs=in_specs,
        out_specs=pl.BlockSpec((1, Cout, Ho * Wo), lambda n: (n, 0, 0)),
        compiler_params=pltpu.CompilerParams(
            dimension_semantics=("parallel",),
            vmem_limit_bytes=_vmem_limit_bytes()),
    )(*operands)

    # (N, Cout, Ho*Wo) -> NCHW is again a free reshape.
    return out_flat.reshape(N, Cout, Ho, Wo)


# ---------------- pure-JAX reference (for verification) ----------------

def reference(x_nchw, params, *, stride, expand_ratio):
    x = jnp.transpose(x_nchw, (0, 2, 3, 1)).astype(jnp.float32)       # NHWC
    N, H, W, Cin = x.shape
    Cout = params["w_proj"].shape[0]
    use_shortcut = (stride == 1) and (Cin == Cout)
    h = x
    if expand_ratio != 1:
        g1, bb1, m1, v1 = params["bn1"]
        h = jnp.einsum("nhwc,oc->nhwo", h, params["w_expand"])
        h = (h - m1) / jnp.sqrt(v1 + BN_EPS) * g1 + bb1
        h = jnp.clip(h, 0.0, 6.0)
    hid = h.shape[-1]
    g2, bb2, m2, v2 = params["bn2"]
    w_dw = jnp.transpose(params["w_dw"], (1, 2, 0))[:, :, None, :]     # (3,3,1,hid)
    d = lax.conv_general_dilated(
        h, w_dw, (stride, stride), [(1, 1), (1, 1)],
        dimension_numbers=("NHWC", "HWIO", "NHWC"), feature_group_count=hid)
    d = (d - m2) / jnp.sqrt(v2 + BN_EPS) * g2 + bb2
    d = jnp.clip(d, 0.0, 6.0)
    g3, bb3, m3, v3 = params["bn3"]
    p = jnp.einsum("nhwc,oc->nhwo", d, params["w_proj"])
    p = (p - m3) / jnp.sqrt(v3 + BN_EPS) * g3 + bb3
    if use_shortcut:
        p = p + x
    return jnp.transpose(p, (0, 3, 1, 2))


# ---------------- parameter init (torch-like layouts, squeezed) ----------------

def make_params(key, in_channel, out_channel, expand_ratio):
    hid = in_channel * expand_ratio
    ks = jax.random.split(key, 6)

    def bn_params(k, c):
        k1, k2, k3, k4 = jax.random.split(k, 4)
        gamma = 1.0 + 0.1 * jax.random.normal(k1, (c,), jnp.float32)
        beta = 0.1 * jax.random.normal(k2, (c,), jnp.float32)
        mean = 0.1 * jax.random.normal(k3, (c,), jnp.float32)
        var = 0.5 + 0.1 * jnp.abs(jax.random.normal(k4, (c,), jnp.float32))
        return (gamma, beta, mean, var)

    return {
        # 1x1 expand conv: torch weight (hid, Cin, 1, 1) -> (hid, Cin)
        "w_expand": 0.1 * jax.random.normal(ks[0], (hid, in_channel), jnp.float32),
        "bn1": bn_params(ks[1], hid),
        # depthwise conv: torch weight (hid, 1, 3, 3) -> (hid, 3, 3)
        "w_dw": 0.1 * jax.random.normal(ks[2], (hid, 3, 3), jnp.float32),
        "bn2": bn_params(ks[3], hid),
        # 1x1 project conv: torch weight (Cout, hid, 1, 1) -> (Cout, hid)
        "w_proj": 0.1 * jax.random.normal(ks[4], (out_channel, hid), jnp.float32),
        "bn3": bn_params(ks[5], out_channel),
    }


if __name__ == "__main__":
    key = jax.random.PRNGKey(0)

    # (N, Cin, H, W, Cout, stride, expand_ratio)
    configs = [
        (2, 4, 16, 16, 4, 1, 2),   # expand + residual shortcut (default case)
        (2, 4, 16, 16, 8, 1, 1),   # expand_ratio=1 path, no shortcut
        (2, 4, 16, 16, 8, 2, 2),   # stride-2 depthwise, no shortcut
    ]
    for idx, (N, Cin, H, W, Cout, stride, er) in enumerate(configs):
        kx, kp, key = jax.random.split(key, 3)
        x = jax.random.normal(kx, (N, Cin, H, W), jnp.float32)
        params = make_params(kp, Cin, Cout, er)

        out = jax.block_until_ready(
            inverted_residual(x, params, stride=stride, expand_ratio=er))
        ref = jax.block_until_ready(
            reference(x, params, stride=stride, expand_ratio=er))

        Ho = (H - 1) // stride + 1
        Wo = (W - 1) // stride + 1
        assert out.shape == (N, Cout, Ho, Wo), (idx, out.shape)
        err = float(jnp.max(jnp.abs(out - ref)))
        assert err < 1e-4, (idx, err)

    print("KERNEL_OK")
</pallas_src>

<mosaic_0001>
module attributes {stable_mosaic.version = 11 : i64} {
  func.func @_fused_ir_kernel(%arg0: i32, %arg1: memref<1x4x256xf32, #tpu.memory_space<vmem>>, %arg2: memref<8x4xf32, #tpu.memory_space<vmem>>, %arg3: memref<8x1xf32, #tpu.memory_space<vmem>>, %arg4: memref<8x9xf32, #tpu.memory_space<vmem>>, %arg5: memref<8x1xf32, #tpu.memory_space<vmem>>, %arg6: memref<4x8xf32, #tpu.memory_space<vmem>>, %arg7: memref<4x1xf32, #tpu.memory_space<vmem>>, %arg8: memref<1x4x256xf32, #tpu.memory_space<vmem>>) attributes {dimension_semantics = [#tpu.dimension_semantics<parallel>], iteration_bounds = array<i64: 2>, scalar_prefetch = 0 : i64, scratch_operands = 0 : i64, tpu.core_type = #tpu.core_type<tc>, window_params = [{transform_indices = @transform_0, window_bounds = array<i64: 1, 4, 256>}, {pipeline_mode = #tpu.pipeline_mode<synchronous>, transform_indices = @transform_1, window_bounds = array<i64: 8, 4>}, {pipeline_mode = #tpu.pipeline_mode<synchronous>, transform_indices = @transform_2, window_bounds = array<i64: 8, 1>}, {pipeline_mode = #tpu.pipeline_mode<synchronous>, transform_indices = @transform_3, window_bounds = array<i64: 8, 9>}, {pipeline_mode = #tpu.pipeline_mode<synchronous>, transform_indices = @transform_4, window_bounds = array<i64: 8, 1>}, {pipeline_mode = #tpu.pipeline_mode<synchronous>, transform_indices = @transform_5, window_bounds = array<i64: 4, 8>}, {pipeline_mode = #tpu.pipeline_mode<synchronous>, transform_indices = @transform_6, window_bounds = array<i64: 4, 1>}, {transform_indices = @transform_7, window_bounds = array<i64: 1, 4, 256>}]} {
    %c0 = arith.constant 0 : index
    %c0_0 = arith.constant 0 : index
    %c0_1 = arith.constant 0 : index
    %0 = vector.load %arg1[%c0, %c0_0, %c0_1] : memref<1x4x256xf32, #tpu.memory_space<vmem>>, vector<1x4x256xf32>
    %1 = vector.shape_cast %0 : vector<1x4x256xf32> to vector<4x256xf32>
    %c0_2 = arith.constant 0 : index
    %c0_3 = arith.constant 0 : index
    %2 = vector.load %arg2[%c0_2, %c0_3] : memref<8x4xf32, #tpu.memory_space<vmem>>, vector<8x4xf32>
    %cst = arith.constant dense<0.000000e+00> : vector<8x256xf32>
    %3 = tpu.matmul %2, %1, %cst {dimension_numbers = #tpu.dot_dimension_numbers<[1], [0], [0], [1], [0, 0, 1, 1], [], []>} : vector<8x4xf32>, vector<4x256xf32>, vector<8x256xf32> -> vector<8x256xf32>
    %c0_4 = arith.constant 0 : index
    %c0_5 = arith.constant 0 : index
    %4 = vector.load %arg3[%c0_4, %c0_5] : memref<8x1xf32, #tpu.memory_space<vmem>>, vector<8x1xf32>
    %5 = vector.broadcast %4 : vector<8x1xf32> to vector<8x256xf32>
    %6 = arith.addf %3, %5 : vector<8x256xf32>
    %cst_6 = arith.constant 0.000000e+00 : f32
    %cst_7 = arith.constant 6.000000e+00 : f32
    %7 = vector.broadcast %cst_6 : f32 to vector<8x256xf32>
    %8 = arith.maximumf %7, %6 : vector<8x256xf32>
    %9 = vector.broadcast %cst_7 : f32 to vector<8x256xf32>
    %10 = arith.minimumf %9, %8 : vector<8x256xf32>
    %cst_8 = arith.constant 0.000000e+00 : f32
    %11 = vector.broadcast %cst_8 : f32 to vector<8x16xf32>
    %cst_9 = arith.constant 0.000000e+00 : f32
    %12 = vector.broadcast %cst_9 : f32 to vector<8x16xf32>
    %13 = tpu.concatenate %10, %11, %12 in 1 : vector<8x256xf32>, vector<8x16xf32>, vector<8x16xf32> -> vector<8x288xf32>
    %c0_10 = arith.constant 0 : index
    %c0_11 = arith.constant 0 : index
    %14 = vector.load %arg4[%c0_10, %c0_11] : memref<8x9xf32, #tpu.memory_space<vmem>>, vector<8x9xf32>
    %15 = tpu.iota {dimensions = array<i32: 1>} : vector<1x256xi32>
    %c16_i32 = arith.constant 16 : i32
    %c0_i32 = arith.constant 0 : i32
    %16 = arith.cmpi eq, %c16_i32, %c0_i32 : i32
    %c1_i32 = arith.constant 1 : i32
    %17 = arith.select %16, %c1_i32, %c16_i32 : i32
    %18 = vector.broadcast %17 : i32 to vector<1x256xi32>
    %19 = arith.remsi %15, %18 : vector<1x256xi32>
    %c0_i32_12 = arith.constant 0 : i32
    %20 = vector.broadcast %c0_i32_12 : i32 to vector<1x256xi32>
    %21 = arith.cmpi ne, %19, %20 : vector<1x256xi32>
    %c0_i32_13 = arith.constant 0 : i32
    %22 = vector.broadcast %c0_i32_13 : i32 to vector<1x256xi32>
    %23 = arith.cmpi slt, %19, %22 : vector<1x256xi32>
    %c0_i32_14 = arith.constant 0 : i32
    %24 = arith.cmpi slt, %17, %c0_i32_14 : i32
    %25 = vector.broadcast %24 : i1 to vector<1x256xi1>
    %26 = vector.broadcast %25 : vector<1x256xi1> to vector<1x256xi1>
    %27 = arith.xori %23, %26 : vector<1x256xi1>
    %28 = arith.andi %27, %21 : vector<1x256xi1>
    %29 = vector.broadcast %17 : i32 to vector<1x256xi32>
    %30 = arith.addi %19, %29 : vector<1x256xi32>
    %31 = arith.select %28, %30, %19 : vector<1x256xi1>, vector<1x256xi32>
    %cst_15 = arith.constant 0.000000e+00 : f32
    %32 = vector.broadcast %cst_15 : f32 to vector<8x256xf32>
    %cst_16 = arith.constant 0.000000e+00 : f32
    %33 = vector.broadcast %cst_16 : f32 to vector<8x256xf32>
    %34 = vector.extract_strided_slice %13 {offsets = [0, 271], sizes = [8, 17], strides = [1, 1]} : vector<8x288xf32> to vector<8x17xf32>
    %35 = vector.extract_strided_slice %13 {offsets = [0, 0], sizes = [8, 239], strides = [1, 1]} : vector<8x288xf32> to vector<8x239xf32>
    %36 = tpu.concatenate %34, %35 in 1 : vector<8x17xf32>, vector<8x239xf32> -> vector<8x256xf32>
    %37 = vector.extract_strided_slice %14 {offsets = [0, 0], sizes = [8, 1], strides = [1, 1]} : vector<8x9xf32> to vector<8x1xf32>
    %38 = vector.broadcast %37 : vector<8x1xf32> to vector<8x256xf32>
    %39 = arith.mulf %36, %38 : vector<8x256xf32>
    %40 = arith.addf %33, %39 : vector<8x256xf32>
    %41 = vector.extract_strided_slice %13 {offsets = [0, 287], sizes = [8, 1], strides = [1, 1]} : vector<8x288xf32> to vector<8x1xf32>
    %42 = vector.extract_strided_slice %13 {offsets = [0, 0], sizes = [8, 255], strides = [1, 1]} : vector<8x288xf32> to vector<8x255xf32>
    %43 = tpu.concatenate %41, %42 in 1 : vector<8x1xf32>, vector<8x255xf32> -> vector<8x256xf32>
    %44 = vector.extract_strided_slice %14 {offsets = [0, 3], sizes = [8, 1], strides = [1, 1]} : vector<8x9xf32> to vector<8x1xf32>
    %45 = vector.broadcast %44 : vector<8x1xf32> to vector<8x256xf32>
    %46 = arith.mulf %43, %45 : vector<8x256xf32>
    %47 = arith.addf %40, %46 : vector<8x256xf32>
    %48 = vector.extract_strided_slice %13 {offsets = [0, 15], sizes = [8, 256], strides = [1, 1]} : vector<8x288xf32> to vector<8x256xf32>
    %49 = vector.extract_strided_slice %14 {offsets = [0, 6], sizes = [8, 1], strides = [1, 1]} : vector<8x9xf32> to vector<8x1xf32>
    %50 = vector.broadcast %49 : vector<8x1xf32> to vector<8x256xf32>
    %51 = arith.mulf %48, %50 : vector<8x256xf32>
    %52 = arith.addf %47, %51 : vector<8x256xf32>
    %c0_i32_17 = arith.constant 0 : i32
    %53 = vector.broadcast %c0_i32_17 : i32 to vector<1x256xi32>
    %54 = arith.cmpi sgt, %31, %53 : vector<1x256xi32>
    %cst_18 = arith.constant 0.000000e+00 : f32
    %55 = vector.shape_cast %54 : vector<1x256xi1> to vector<1x256xi1>
    %56 = vector.broadcast %55 : vector<1x256xi1> to vector<8x256xi1>
    %57 = vector.broadcast %cst_18 : f32 to vector<8x256xf32>
    %58 = arith.select %56, %52, %57 : vector<8x256xi1>, vector<8x256xf32>
    %59 = arith.addf %32, %58 : vector<8x256xf32>
    %cst_19 = arith.constant 0.000000e+00 : f32
    %60 = vector.broadcast %cst_19 : f32 to vector<8x256xf32>
    %61 = vector.extract_strided_slice %13 {offsets = [0, 272], sizes = [8, 16], strides = [1, 1]} : vector<8x288xf32> to vector<8x16xf32>
    %62 = vector.extract_strided_slice %13 {offsets = [0, 0], sizes = [8, 240], strides = [1, 1]} : vector<8x288xf32> to vector<8x240xf32>
    %63 = tpu.concatenate %61, %62 in 1 : vector<8x16xf32>, vector<8x240xf32> -> vector<8x256xf32>
    %64 = vector.extract_strided_slice %14 {offsets = [0, 1], sizes = [8, 1], strides = [1, 1]} : vector<8x9xf32> to vector<8x1xf32>
    %65 = vector.broadcast %64 : vector<8x1xf32> to vector<8x256xf32>
    %66 = arith.mulf %63, %65 : vector<8x256xf32>
    %67 = arith.addf %60, %66 : vector<8x256xf32>
    %68 = vector.extract_strided_slice %13 {offsets = [0, 0], sizes = [8, 256], strides = [1, 1]} : vector<8x288xf32> to vector<8x256xf32>
    %69 = vector.extract_strided_slice %14 {offsets = [0, 4], sizes = [8, 1], strides = [1, 1]} : vector<8x9xf32> to vector<8x1xf32>
    %70 = vector.broadcast %69 : vector<8x1xf32> to vector<8x256xf32>
    %71 = arith.mulf %68, %70 : vector<8x256xf32>
    %72 = arith.addf %67, %71 : vector<8x256xf32>
    %73 = vector.extract_strided_slice %13 {offsets = [0, 16], sizes = [8, 256], strides = [1, 1]} : vector<8x288xf32> to vector<8x256xf32>
    %74 = vector.extract_strided_slice %14 {offsets = [0, 7], sizes = [8, 1], strides = [1, 1]} : vector<8x9xf32> to vector<8x1xf32>
    %75 = vector.broadcast %74 : vector<8x1xf32> to vector<8x256xf32>
    %76 = arith.mulf %73, %75 : vector<8x256xf32>
    %77 = arith.addf %72, %76 : vector<8x256xf32>
    %78 = arith.addf %59, %77 : vector<8x256xf32>
    %cst_20 = arith.constant 0.000000e+00 : f32
    %79 = vector.broadcast %cst_20 : f32 to vector<8x256xf32>
    %80 = vector.extract_strided_slice %13 {offsets = [0, 273], sizes = [8, 15], strides = [1, 1]} : vector<8x288xf32> to vector<8x15xf32>
    %81 = vector.extract_strided_slice %13 {offsets = [0, 0], sizes = [8, 241], strides = [1, 1]} : vector<8x288xf32> to vector<8x241xf32>
    %82 = tpu.concatenate %80, %81 in 1 : vector<8x15xf32>, vector<8x241xf32> -> vector<8x256xf32>
    %83 = vector.extract_strided_slice %14 {offsets = [0, 2], sizes = [8, 1], strides = [1, 1]} : vector<8x9xf32> to vector<8x1xf32>
    %84 = vector.broadcast %83 : vector<8x1xf32> to vector<8x256xf32>
    %85 = arith.mulf %82, %84 : vector<8x256xf32>
    %86 = arith.addf %79, %85 : vector<8x256xf32>
    %87 = vector.extract_strided_slice %13 {offsets = [0, 1], sizes = [8, 256], strides = [1, 1]} : vector<8x288xf32> to vector<8x256xf32>
    %88 = vector.extract_strided_slice %14 {offsets = [0, 5], sizes = [8, 1], strides = [1, 1]} : vector<8x9xf32> to vector<8x1xf32>
    %89 = vector.broadcast %88 : vector<8x1xf32> to vector<8x256xf32>
    %90 = arith.mulf %87, %89 : vector<8x256xf32>
    %91 = arith.addf %86, %90 : vector<8x256xf32>
    %92 = vector.extract_strided_slice %13 {offsets = [0, 17], sizes = [8, 256], strides = [1, 1]} : vector<8x288xf32> to vector<8x256xf32>
    %93 = vector.extract_strided_slice %14 {offsets = [0, 8], sizes = [8, 1], strides = [1, 1]} : vector<8x9xf32> to vector<8x1xf32>
    %94 = vector.broadcast %93 : vector<8x1xf32> to vector<8x256xf32>
    %95 = arith.mulf %92, %94 : vector<8x256xf32>
    %96 = arith.addf %91, %95 : vector<8x256xf32>
    %c15_i32 = arith.constant 15 : i32
    %97 = vector.broadcast %c15_i32 : i32 to vector<1x256xi32>
    %98 = arith.cmpi slt, %31, %97 : vector<1x256xi32>
    %cst_21 = arith.constant 0.000000e+00 : f32
    %99 = vector.shape_cast %98 : vector<1x256xi1> to vector<1x256xi1>
    %100 = vector.broadcast %99 : vector<1x256xi1> to vector<8x256xi1>
    %101 = vector.broadcast %cst_21 : f32 to vector<8x256xf32>
    %102 = arith.select %100, %96, %101 : vector<8x256xi1>, vector<8x256xf32>
    %103 = arith.addf %78, %102 : vector<8x256xf32>
    %c0_22 = arith.constant 0 : index
    %c0_23 = arith.constant 0 : index
    %104 = vector.load %arg5[%c0_22, %c0_23] : memref<8x1xf32, #tpu.memory_space<vmem>>, vector<8x1xf32>
    %105 = vector.broadcast %104 : vector<8x1xf32> to vector<8x256xf32>
    %106 = arith.addf %103, %105 : vector<8x256xf32>
    %cst_24 = arith.constant 0.000000e+00 : f32
    %cst_25 = arith.constant 6.000000e+00 : f32
    %107 = vector.broadcast %cst_24 : f32 to vector<8x256xf32>
    %108 = arith.maximumf %107, %106 : vector<8x256xf32>
    %109 = vector.broadcast %cst_25 : f32 to vector<8x256xf32>
    %110 = arith.minimumf %109, %108 : vector<8x256xf32>
    %c0_26 = arith.constant 0 : index
    %c0_27 = arith.constant 0 : index
    %111 = vector.load %arg6[%c0_26, %c0_27] : memref<4x8xf32, #tpu.memory_space<vmem>>, vector<4x8xf32>
    %cst_28 = arith.constant dense<0.000000e+00> : vector<4x256xf32>
    %112 = tpu.matmul %111, %110, %cst_28 {dimension_numbers = #tpu.dot_dimension_numbers<[1], [0], [0], [1], [0, 0, 1, 1], [], []>} : vector<4x8xf32>, vector<8x256xf32>, vector<4x256xf32> -> vector<4x256xf32>
    %c0_29 = arith.constant 0 : index
    %c0_30 = arith.constant 0 : index
    %113 = vector.load %arg7[%c0_29, %c0_30] : memref<4x1xf32, #tpu.memory_space<vmem>>, vector<4x1xf32>
    %114 = vector.broadcast %113 : vector<4x1xf32> to vector<4x256xf32>
    %115 = arith.addf %112, %114 : vector<4x256xf32>
    %c0_31 = arith.constant 0 : index
    %c0_32 = arith.constant 0 : index
    %c0_33 = arith.constant 0 : index
    %116 = vector.load %arg1[%c0_31, %c0_32, %c0_33] : memref<1x4x256xf32, #tpu.memory_space<vmem>>, vector<1x4x256xf32>
    %117 = vector.shape_cast %116 : vector<1x4x256xf32> to vector<4x256xf32>
    %118 = arith.addf %115, %117 : vector<4x256xf32>
    %c0_34 = arith.constant 0 : index
    %c0_35 = arith.constant 0 : index
    %c0_36 = arith.constant 0 : index
    %119 = vector.load %arg8[%c0_34, %c0_35, %c0_36] : memref<1x4x256xf32, #tpu.memory_space<vmem>>, vector<1x4x256xf32>
    %120 = vector.shape_cast %119 : vector<1x4x256xf32> to vector<4x256xf32>
    %121 = vector.shape_cast %118 : vector<4x256xf32> to vector<1x4x256xf32>
    tpu.vector_store %arg8[%c0_34, %c0_35, %c0_36], %121 {strides = array<i32>} : memref<1x4x256xf32, #tpu.memory_space<vmem>>, vector<1x4x256xf32>,
    return
  }
  func.func @transform_0(%arg0: i32) -> (i32, i32, i32) {
    %c0_i32 = arith.constant 0 : i32
    %c0_i32_0 = arith.constant 0 : i32
    %c0_i32_1 = arith.constant 0 : i32
    return %arg0, %c0_i32, %c0_i32_0 : i32, i32, i32
  }
  func.func @transform_1(%arg0: i32) -> (i32, i32) {
    %c0_i32 = arith.constant 0 : i32
    %c0_i32_0 = arith.constant 0 : i32
    %c0_i32_1 = arith.constant 0 : i32
    return %c0_i32, %c0_i32_0 : i32, i32
  }
  func.func @transform_2(%arg0: i32) -> (i32, i32) {
    %c0_i32 = arith.constant 0 : i32
    %c0_i32_0 = arith.constant 0 : i32
    %c0_i32_1 = arith.constant 0 : i32
    return %c0_i32, %c0_i32_0 : i32, i32
  }
  func.func @transform_3(%arg0: i32) -> (i32, i32) {
    %c0_i32 = arith.constant 0 : i32
    %c0_i32_0 = arith.constant 0 : i32
    %c0_i32_1 = arith.constant 0 : i32
    return %c0_i32, %c0_i32_0 : i32, i32
  }
  func.func @transform_4(%arg0: i32) -> (i32, i32) {
    %c0_i32 = arith.constant 0 : i32
    %c0_i32_0 = arith.constant 0 : i32
    %c0_i32_1 = arith.constant 0 : i32
    return %c0_i32, %c0_i32_0 : i32, i32
  }
  func.func @transform_5(%arg0: i32) -> (i32, i32) {
    %c0_i32 = arith.constant 0 : i32
    %c0_i32_0 = arith.constant 0 : i32
    %c0_i32_1 = arith.constant 0 : i32
    return %c0_i32, %c0_i32_0 : i32, i32
  }
  func.func @transform_6(%arg0: i32) -> (i32, i32) {
    %c0_i32 = arith.constant 0 : i32
    %c0_i32_0 = arith.constant 0 : i32
    %c0_i32_1 = arith.constant 0 : i32
    return %c0_i32, %c0_i32_0 : i32, i32
  }
  func.func @transform_7(%arg0: i32) -> (i32, i32, i32) {
    %c0_i32 = arith.constant 0 : i32
    %c0_i32_0 = arith.constant 0 : i32
    %c0_i32_1 = arith.constant 0 : i32
    return %arg0, %c0_i32, %c0_i32_0 : i32, i32, i32
  }
}

</mosaic_0001>

<bundles_post_ra>
// kernel: tpu_custom_call.1
= control target key start
LH: loop header
LB: loop body
LE: loop exit
PB: predicated region body
PF: predicated region fallthrough
CT: control target
= control target key end

     0   :  { %12 = vsyncpa [#allocation3], 0  ;;  %s1170_s0 = inlined_call_operand.vmem [shape: f32[2,4,256], index: 0, kind: input, shape index: {}]   ;;  %s1171_s1 = inlined_call_operand.vmem [shape: f32[8,4], index: 1, kind: input, shape index: {}]   ;;  %s1172_s2 = inlined_call_operand.vmem [shape: f32[8,1], index: 2, kind: input, shape index: {}]   ;;  %s1173_s3 = inlined_call_operand.vmem [shape: f32[8,9], index: 3, kind: input, shape index: {}]   ;;  %s1174_s4 = inlined_call_operand.vmem [shape: f32[8,1], index: 4, kind: input, shape index: {}]   ;;  %s1175_s5 = inlined_call_operand.vmem [shape: f32[4,8], index: 5, kind: input, shape index: {}]   ;;  %s1176_s6 = inlined_call_operand.vmem [shape: f32[4,1], index: 6, kind: input, shape index: {}]   ;;  %s1177_s7 = inlined_call_operand.hbm [shape: f32[2,4,256], index: 7, kind: output, shape index: {}]  }
   0x1   :  { %14 = vsyncpa [#allocation3 + $0x1], 0  ;;  %s991_s24 = smov 0   ;;  %s993_s25 = smov 0  }
   0x2   :  { %s995_s26 = smov 0   ;;  %s997_s27 = smov 0  }
   0x3 LB: > { %s1012_s28 = sadd.s32 4294967295, %s929_s27   ;;  %s781_s29 = sadd.s32 4294967294, %s929_s27   ;;  %s929_s27 = sphi %s997_s27, %s1187_s27   ;;  %s925_s26 = sphi %s995_s26, %s1186_s26   ;;  %s921_s25 = sphi %s993_s25, %s1185_s25   ;;  %s917_s24 = sphi %s991_s24, %s1184_s24  }
   0x4   : > { %s1016_s30 = sadd.s32 1, %s929_s27   ;;  %s179_s8 = sadd.s32 1, %s925_s26 }
   0x5   : > { %s176_s9 = ssub.s32 %s929_s27, %s1016_s30  ;;  %p189_p0 = scmp.ne.s32.totalorder %s925_s26, %s921_s25 }
   0x6   : > { %p177_p1 = scmp.eq.s32.totalorder %s176_s9, 0  ;;  %p190_p2 = scmp.eq.s32.totalorder %s1012_s28, 1 }
   0x7   : > { %p195_p3 = scmp.ne.s32.totalorder %s921_s25, %s917_s24  ;;  %p196_p4 = scmp.eq.s32.totalorder %s781_s29, 1 }
   0x8   : > { %s1027_s10 = scalar_select %p177_p1, %s925_s26, %s179_s8  }
   0x9   : > { %p1029_p5 = por %p190_p2, %p189_p0  ;;  %p1033_p6 = por %p196_p4, %p195_p3 }
   0xa   : > { %p784_p7 = scmp.ge.s32.totalorder %s929_s27, 1  ;;  %p240_p8 = scmp.lt.s32.totalorder %s929_s27, 3 }
   0xc   : > { %p241_p9 = pnand %p784_p7, %p240_p8 }
   0xd   : > { %p272_p10 = scmp.lt.s32.totalorder (!%p241_p9), %s1012_s28, 1  ;;  %s939_s29 = smov (!%p241_p9), 97  }
   0xe   : > { %244 = sbr.rel (%p241_p9) target bundleno = 606 (0x25e), region = 48  ;;  %s941_s8 = smov (!%p241_p9), 111  }
   0xf   : > { %s943_s9 = smov (!%p241_p9), 113   ;;  %s944_s13 = smov (!%p241_p9), 112  }
  0x10   : > { %s945_s14 = smov (!%p241_p9), 127   ;;  %s947_s16 = smov (!%p241_p9), 17  }
  0x11   : > { %s948_s17 = smov (!%p241_p9), 1  }
  0x13   : > { %v931_v0 = vmov 0.0   ;;  %v932_v1 = vmov 0   ;;  %v279_v2 = vld [vmem:[%s1172_s2] sm:$0xff]  ;;  %s273_s15 = scalar_select %p272_p10, %s1012_s28, 1  ;;  %v933_v4 = vmov 5   ;;  %vm291_vm0 = vcmask 1043456  }
  0x14   : > { %360 = vmatprep.mubr.f32.mxu0 %v931_v0  ;;  %857 = vset.pattern.permute.xlu0 %v932_v1  ;;  %v371_v3 = vld [vmem:[%s1173_s3] sm:$0xff]  ;;  %v934_v6 = vmov 6   ;;  %v935_v8 = vmov 7   ;;  %vm287_vm1 = vcmask 31744   ;;  %v936_v10 = vmov 4  }
  0x15   : > { %282 = vperm.xlu0 %857, %v279_v2   ;;  %859 = vset.pattern.permute.xlu1 %v933_v4  ;;  %s797_s18 = sshll.u32 %s273_s15, 3  ;;  %v278_v9 = vld [vmem:[%s1171_s1] sm:$0xff]  ;;  %v937_v11 = vmov 8   ;;  %v938_v12 = vmov 3   ;;  %v940_v13 = vmov 1   ;;  %v942_v14 = vmov 2  }
  0x16   : > { %550 = vperm.xlu1 %859, %v371_v3   ;;  %692 = vmatprep.mubr.f32.mxu1 %v931_v0  ;;  %s276_s21 = scalar_lea.vmem %s1170_s0, %s797_s18  ;;  %s946_s15 = smov 15   ;;  %v618_v40 = vld [vmem:[%s1176_s6] sm:$0xf]  ;;  %v372_v63 = vlaneseq  ;;  %vm430_vm2 = vcmask 7168   ;;  %vm409_vm3 = vcmask 138240   ;;  %vm536_vm4 = vcmask 121856  }
  0x17   : > { %v1050_v5 = vld [vmem:[%s276_s21] sm:$0xff]  ;;  %s949_s18 = smov 16   ;;  %vm483_vm5 = vcmask 130048   ;;  %vm520_vm6 = vcmask 916480   ;;  %vm459_vm7 = vcmask 924672   ;;  %vm588_vm8 = vcmask 908288  }
  0x18   : > { %v1054_v7 = vcombine.high %v1050_v5, %v1050_v5  ;;  %v605_v41 = vld [vmem:[%s1174_s4] sm:$0xff]  ;;  %v373_v2 = vand.u32 127, %v372_v63  ;;  %vm565_vm9 = vcmask 1039360   ;;  %vm624_vm14 = vcmask 64512  }
  0x19   : > { %858 = vset.pattern.permute.xlu0 %v934_v6 }
  0x1a   : > { %444 = vperm.xlu0 %858, %v371_v3   ;;  %860 = vset.pattern.permute.xlu1 %v935_v8 }
  0x1b   : > { %505 = vperm.xlu1 %860, %v371_v3   ;;  %788 = vmatprep.subr.msk.mxu0 %vm291_vm0, %v1054_v7 }
  0x1c   : > { %789 = vmatpush1.msk.msra.mxu0 %vm291_vm0, %v1050_v5 }
  0x1d   : > { %790 = vmatmul.mubr.msk.f32.vlgmr.msra.gmra.mxu0 %vm287_vm1, %v278_v9  ;;  %v374_v9 = vadd.s32 128, %v373_v2 }
  0x1e   : > { %864 = vset.pattern.permute.xlu0 %v936_v10 }
  0x1f   : > { %861 = vset.pattern.permute.xlu1 %v937_v11  ;;  %497 = vperm.xlu0 %864, %v371_v3  }
  0x20   : > { %573 = vperm.xlu1 %861, %v371_v3  }
  0x23   : > { %865 = vset.pattern.permute.xlu0 %v932_v1 }
  0x24   : > { %862 = vset.pattern.permute.xlu1 %v938_v12  ;;  %416 = vperm.xlu0 %865, %v371_v3  }
  0x25   : > { %436 = vperm.xlu1 %862, %v371_v3  }
  0x28   : > { %423 = vrot.lane.b32.xlu0 %v931_v0, %s939_s29 }
  0x29   : > { %863 = vset.pattern.permute.xlu1 %v940_v13 }
  0x2a   : > { %489 = vperm.xlu1 %863, %v371_v3  }
  0x2c   : > { %529 = vrot.lane.b32.xlu0 %v931_v0, %s941_s8 }
  0x2e   : > { %866 = vset.pattern.permute.xlu1 %v942_v14 }
  0x2f   : > { %542 = vperm.xlu1 %866, %v371_v3  }
  0x33   : > { %400 = vrot.lane.b32.xlu1 %v931_v0, %s943_s9 }
  0x34   : > { %867 = vset.pattern.permute.xlu1 %v932_v1 }
  0x37   : > { %476 = vrot.lane.b32.xlu1 %v931_v0, %s944_s13 }
  0x90   : > { %v283_v15 = vpop.permute.xlu0 %282 }
  0x91   : > { %v551_v16 = vpop.permute.xlu1 %550 }
  0x92   : > { %v555_v21 = vmul.f32 0.0, %v551_v16 }
  0x95   : > { %v445_v17 = vpop.permute.xlu0 %444 }
  0x96   : > { %v449_v18 = vmul.f32 0.0, %v445_v17  ;;  %v506_v19 = vpop.permute.xlu1 %505 }
  0x97   : > { %v510_v20 = vmul.f32 0.0, %v506_v19 }
  0x98   : > { %457 = vrot.lane.b32.xlu0 %v449_v18, %s943_s9  ;;  %v379_v18 = vand.u32 15, %v373_v2 }
  0x99   : > { %518 = vrot.lane.b32.xlu1 %v510_v20, %s944_s13 }
  0x9a   : > { %v1102_v44 = vpop.permute.xlu0 %497  ;;  %vm1115_vm10 = vcmp.gt.s32.totalorder %v379_v18, 0  ;;  %vm595_vm12 = vcmp.lt.s32.totalorder %v379_v18, 15 }
  0x9b   : > { %v574_v22 = vpop.permute.xlu1 %573 }
  0x9c   : > { %563 = vrot.lane.b32.xlu0 %v555_v21, %s945_s14  ;;  %v578_v23 = vmul.f32 0.0, %v574_v22 }
  0x9e   : > { %586 = vrot.lane.b32.xlu1 %v578_v23, %s941_s8 }
  0x9f   : > { %v417_v46 = vpop.permute.xlu0 %416 }
  0xa0   : > { %v437_v42 = vpop.permute.xlu1 %436 }
  0xa3   : > { %v424_v48 = vpop.permute.xlu0 %423 }
  0xa5   : > { %v490_v43 = vpop.permute.xlu1 %489 }
  0xa7   : > { %v530_v50 = vpop.permute.xlu0 %529 }
  0xaa   : > { %v543_v45 = vpop.permute.xlu1 %542 }
  0xae   : > { %v401_v47 = vpop.permute.xlu1 %400 }
  0xb2   : > { %v477_v49 = vpop.permute.xlu1 %476 }
  0xdd   : > { %v362_v24 = vpop.f32.mrf.mxu0 }
  0xde   : > { %v363_v25 = vadd.f32 %v362_v24, %v283_v15 }
  0xdf   : > { %v364_v26 = vpop.f32.mrf.mxu0 }
  0xe0   : > { %v367_v27 = vmax.f32 %v363_v25, 0.0  ;;  %v365_v28 = vadd.f32 %v364_v26, %v283_v15 }
  0xe2   : > { %v1068_v29 = vmin.f32 %v367_v27, 6.0  ;;  %v368_v30 = vmax.f32 %v365_v28, 0.0 }
  0xe4   : > { %532 = vrot.lane.b32.xlu0 %v1068_v29, %s946_s15  ;;  %405 = vrot.lane.b32.xlu1 %v1068_v29, %s947_s16  ;;  %v1072_v31 = vmin.f32 %v368_v30, 6.0  ;;  %v553_v32 = vmul.f32 %v551_v16, %v1068_v29  ;;  %v447_v33 = vmul.f32 %v445_v17, %v1068_v29  ;;  %v508_v35 = vmul.f32 %v506_v19, %v1068_v29 }
  0xe5   : > { %v576_v38 = vmul.f32 %v574_v22, %v1068_v29 }
  0xe6   : > { %v509_v34 = vmul.f32 %v506_v19, %v1072_v31  ;;  %v577_v36 = vmul.f32 %v574_v22, %v1072_v31  ;;  %v448_v37 = vmul.f32 %v445_v17, %v1072_v31  ;;  %v554_v39 = vmul.f32 %v551_v16, %v1072_v31 }
  0xe7   : > { %v386_v19 = vand.u32 15, %v374_v9 }
  0xe8   : > { %407 = vrot.lane.b32.xlu0 %v1072_v31, %s947_s16  ;;  %426 = vrot.lane.b32.xlu1 %v1068_v29, %s948_s17 }
  0xe9   : > { %vm1119_vm11 = vcmp.gt.s32.totalorder %v386_v19, 0  ;;  %vm596_vm13 = vcmp.lt.s32.totalorder %v386_v19, 15 }
  0xec   : > { %428 = vrot.lane.b32.xlu0 %v1072_v31, %s948_s17  ;;  %479 = vrot.lane.b32.xlu1 %v1068_v29, %s949_s18 }
  0xf0   : > { %481 = vrot.lane.b32.xlu0 %v1072_v31, %s949_s18  ;;  %534 = vrot.lane.b32.xlu1 %v1072_v31, %s946_s15 }
  0xf4   : > { %559 = vrot.lane.b32.xlu0 %v553_v32, %s945_s14  ;;  %453 = vrot.lane.b32.xlu1 %v447_v33, %s943_s9 }
  0xf8   : > { %516 = vrot.lane.b32.xlu0 %v509_v34, %s944_s13  ;;  %514 = vrot.lane.b32.xlu1 %v508_v35, %s944_s13  ;;  %s798_s13 = sshll.u32 %s1012_s28, 7  ;;  %s950_s28 = smov [#allocation2]  }
  0xf9   : > { %s720_s18 = scalar_lea.hbm %s1177_s7, %s798_s13  ;;  %s873_s21 = sshll.u32 %s950_s28, 4  ;;  %s874_s21 = int_to_ptr.vmem [resolvable:$false] %s873_s21 }
  0xfa   : > { %s875_s22 = scalar_lea.vmem %s874_s21, 256 }
  0xfc   : > { %584 = vrot.lane.b32.xlu0 %v577_v36, %s941_s8  ;;  %455 = vrot.lane.b32.xlu1 %v448_v37, %s943_s9 }
 0x100   : > { %582 = vrot.lane.b32.xlu0 %v576_v38, %s941_s8  ;;  %561 = vrot.lane.b32.xlu1 %v554_v39, %s945_s14  ;;  %s269_s8 = sand.u32 1, %s921_s25  }
 0x101   : > { %s785_s9 = sshll.u32 %s269_s8, 3  ;;  %s708_s19 = scalar_lea.sflag [#allocation3], %s269_s8 }
 0x102   : > { %s271_s14 = scalar_lea.vmem [#allocation2], %s785_s9 }
 0x103   : > { %s722_s15 = sshll.u32 %s271_s14, 4  ;;  %s723_s15 = int_to_ptr.vmem [resolvable:$true] %s722_s15 }
 0x104   : > { %621 = vperm.xlu0 %865, %v618_v40   ;;  %608 = vperm.xlu1 %867, %v605_v41   ;;  %v500_v40 = vmul.f32 %v1102_v44, %v1068_v29  ;;  %v501_v41 = vmul.f32 %v1102_v44, %v1072_v31  ;;  %s869_s20 = scalar_lea.vmem %s723_s15, 128  ;;  %p876_p0 = scmp.lt.s32.totalorder %s723_s15, %s874_s21 }
 0x105   : > { %p870_p11 = scmp.ne.s32.totalorder %s723_s15, %s869_s20  ;;  %p877_p1 = scmp.lt.s32.totalorder %s875_s22, %s869_s20 }
 0x107   : > { %p871_p12 = pnand %p870_p11, %p1029_p5  ;;  %p878_p2 = por %p877_p1, %p876_p0 }
 0x109   : > { %p872_p13 = pneg %p871_p12 }
 0x10a   : > { %v458_v52 = vpop.permute.xlu0 %457 }
 0x10b   : > { %v1104_v51 = vpop.permute.xlu1 %518  ;;  %p879_p3 = pnand %p878_p2, %p872_p13 }
 0x10e   : > { %v564_v54 = vpop.permute.xlu0 %563 }
 0x110   : > { %v587_v53 = vpop.permute.xlu1 %586 }
 0x156   : > { %v533_v55 = vpop.permute.xlu0 %532  ;;  %v406_v56 = vpop.permute.xlu1 %405 }
 0x157   : > { %v413_v10 = vsel %vm409_vm3, %v401_v47, %v406_v56  ;;  %v540_v14 = vsel %vm536_vm4, %v530_v50, %v533_v55 }
 0x158   : > { %v419_v20 = vmul.f32 %v417_v46, %v413_v10  ;;  %v545_v24 = vmul.f32 %v543_v45, %v540_v14 }
 0x15a   : > { %v408_v57 = vpop.permute.xlu0 %407  ;;  %v427_v58 = vpop.permute.xlu1 %426 }
 0x15b   : > { %v434_v6 = vsel %vm430_vm2, %v424_v48, %v427_v58  ;;  %v410_v11 = vsel %vm409_vm3, %v406_v56, %v408_v57 }
 0x15c   : > { %v439_v15 = vmul.f32 %v437_v42, %v434_v6  ;;  %v420_v21 = vmul.f32 %v417_v46, %v410_v11  ;;  %v617_v6 = vld [vmem:[%s1175_s5] sm:$0xf] }
 0x15e   : > { %v429_v59 = vpop.permute.xlu0 %428  ;;  %v480_v60 = vpop.permute.xlu1 %479  ;;  %v441_v30 = vadd.f32 %v439_v15, %v419_v20 }
 0x15f   : > { %v431_v8 = vsel %vm430_vm2, %v427_v58, %v429_v59  ;;  %v487_v22 = vsel %vm483_vm5, %v477_v49, %v480_v60 }
 0x160   : > { %v440_v16 = vmul.f32 %v437_v42, %v431_v8  ;;  %v492_v36 = vmul.f32 %v490_v43, %v487_v22 }
 0x162   : > { %v482_v61 = vpop.permute.xlu0 %481  ;;  %v535_v62 = vpop.permute.xlu1 %534  ;;  %v442_v32 = vadd.f32 %v440_v16, %v420_v21 }
 0x163   : > { %v537_v17 = vsel %vm536_vm4, %v533_v55, %v535_v62  ;;  %v484_v23 = vsel %vm483_vm5, %v480_v60, %v482_v61 }
 0x164   : > { %v546_v25 = vmul.f32 %v543_v45, %v537_v17  ;;  %v493_v37 = vmul.f32 %v490_v43, %v484_v23 }
 0x166   : > { %v560_v0 = vpop.permute.xlu0 %559  ;;  %v454_v1 = vpop.permute.xlu1 %453  ;;  %v503_v50 = vadd.f32 %v501_v41, %v493_v37 }
 0x16a   : > { %v517_v3 = vpop.permute.xlu0 %516  ;;  %v515_v4 = vpop.permute.xlu1 %514 }
 0x16b   : > { %v522_v29 = vsel %vm520_vm6, %v517_v3, %v1104_v51  ;;  %v521_v49 = vsel %vm520_vm6, %v515_v4, %v517_v3 }
 0x16c   : > { %v526_v55 = vadd.f32 %v522_v29, %v503_v50 }
 0x16e   : > { %v585_v12 = vpop.permute.xlu0 %584  ;;  %v456_v13 = vpop.permute.xlu1 %455 }
 0x16f   : > { %v460_v26 = vsel %vm459_vm7, %v454_v1, %v456_v13  ;;  %v461_v27 = vsel %vm459_vm7, %v456_v13, %v458_v52  ;;  %v590_v46 = vsel %vm588_vm8, %v585_v12, %v587_v53  ;;  %v502_v52 = vadd.f32 %v500_v40, %v492_v36 }
 0x170   : > { %v464_v42 = vadd.f32 %v460_v26, %v441_v30  ;;  %v465_v45 = vadd.f32 %v461_v27, %v442_v32 }
 0x171   : > { %v525_v56 = vadd.f32 %v521_v49, %v502_v52 }
 0x172   : > { %v562_v28 = vpop.permute.xlu1 %561  ;;  %v583_v33 = vpop.permute.xlu0 %582  ;;  %v472_v53 = vsel %vm1115_vm10, %v464_v42, 0.0 }
 0x173   : > { %v566_v34 = vsel %vm565_vm9, %v560_v0, %v562_v28  ;;  %v567_v35 = vsel %vm565_vm9, %v562_v28, %v564_v54  ;;  %v589_v43 = vsel %vm588_vm8, %v583_v33, %v585_v12  ;;  %v473_v54 = vsel %vm1119_vm11, %v465_v45, 0.0 }
 0x174   : > { %v570_v38 = vadd.f32 %v566_v34, %v545_v24  ;;  %v571_v39 = vadd.f32 %v567_v35, %v546_v25  ;;  %v527_v59 = vadd.f32 %v525_v56, %v472_v53  ;;  %v528_v51 = vadd.f32 %v526_v55, %v473_v54 }
 0x176   : > { %v593_v31 = vadd.f32 %v589_v43, %v570_v38  ;;  %v594_v44 = vadd.f32 %v590_v46, %v571_v39 }
 0x178   : > { %v601_v57 = vsel %vm595_vm12, %v593_v31, 0.0  ;;  %v602_v58 = vsel %vm596_vm13, %v594_v44, 0.0 }
 0x179   : > { %v603_v60 = vadd.f32 %v601_v57, %v527_v59  ;;  %v604_v61 = vadd.f32 %v602_v58, %v528_v51 }
 0x17f   : > { %v609_v62 = vpop.permute.xlu1 %608  ;;  %v622_v8 = vpop.permute.xlu0 %621 }
 0x180   : > { %v611_v63 = vadd.f32 %v609_v62, %v603_v60  ;;  %v612_v0 = vadd.f32 %v609_v62, %v604_v61 }
 0x182   : > { %v613_v1 = vmax.f32 %v611_v63, 0.0  ;;  %v614_v2 = vmax.f32 %v612_v0, 0.0 }
 0x184   : > { %v616_v3 = vmin.f32 %v614_v2, 6.0  ;;  %v615_v4 = vmin.f32 %v613_v1, 6.0 }
 0x186   : > { %658 = vmatprep.subr.mxu1 %v616_v3 }
 0x187   : > { %659 = vmatpush1.msra.mxu1 %v615_v4 }
 0x188   : > { %791 = vmatmul.mubr.msk.f32.vlgmr.msra.gmra.mxu1 %vm624_vm14, %v617_v6 }
 0x248   : > { %v694_v9 = vpop.f32.mrf.mxu1 }
 0x249   : > { %v695_v10 = vadd.f32 %v694_v9, %v622_v8 }
 0x24a   : > { %v696_v11 = vpop.f32.mrf.mxu1 }
 0x24b   : > { %v697_v12 = vadd.f32 %v696_v11, %v622_v8  ;;  %v700_v13 = vadd.f32 %v695_v10, %v1050_v5 }
 0x24d   : > { %v701_v14 = vadd.f32 %v697_v12, %v1054_v7 }
 0x24f   : > { %v704_v15 = vcombine.low %v700_v13, %v701_v14 }
 0x251   : > { %706 = vst [vmem:[%s271_s14] sm:$0xff] %v704_v15 }
 0x252   : > { %882 = shalt.err (!%p879_p3)
}
 0x253   : > { %s883_s23 = scalar_lea.hbm %s720_s18, 128  ;;  %s887_s9 = scalar_lea.hbm %s1177_s7, 256 }
 0x254   : > { %p884_p4 = scmp.ne.s32.totalorder %s720_s18, %s883_s23  ;;  %p888_p9 = scmp.lt.s32.totalorder %s720_s18, %s1177_s7 }
 0x255   : > { %p889_p10 = scmp.lt.s32.totalorder %s887_s9, %s883_s23 }
 0x256   : > { %p885_p7 = pnand %p884_p4, %p1029_p5 }
 0x257   : > { %p890_p11 = por %p889_p10, %p888_p9 }
 0x258   : > { %p886_p8 = pneg %p885_p7 }
 0x25a   : > { %p891_p12 = pnand %p890_p11, %p886_p8 }
 0x25c   : > { %894 = shalt.err (!%p891_p12)
}
 0x25d   : > { %799 = dma.vmem_to_hbm [thread:$0]  (%p1029_p5), %s723_s15, 128, %s720_s18, %s708_s19  }
 0x25e PF: > { %p805_p13 = scmp.ge.s32.totalorder %s929_s27, 2  ;;  %s734_s16 = sand.u32 1, %s917_s24  }
 0x25f   : > { %s735_s17 = scalar_lea.sflag [#allocation3], %s734_s16 }
 0x260   : > { %p802_p0 = pnand %p805_p13, %p1033_p6 }
 0x262   : > { %p803_p1 = pneg %p802_p0 }
 0x264   : > { %912 = dma.done.wait (%p803_p1), %s735_s17, 128  }
 0x265   : > { %914 = vsyncadd (%p803_p1), %s735_s17, 4294967168  ;;  %p17_p2 = scmp.ge.s32.totalorder %s1016_s30, 4   ;;  %s1184_s24 = smov %s921_s25 }
 0x266   : > { %s1185_s25 = smov %s925_s26  ;;  %s1186_s26 = smov %s1027_s10 }
 0x267   : > { %s1187_s27 = smov %s1016_s30  ;;  %19 = sbr.rel (!%p17_p2) target bundleno = 3 (0x3), region = 83 }
 0x26c   :  { %740 = vsyncpa [#allocation3], 1 }
 0x26d   :  { %742 = vsyncpa [#allocation3 + $0x1], 1 }

</bundles_post_ra>
